<compile_context>
chip_gen: v7x
topology: tpu7x:2x2x1
jax: 0.10.0
libtpu: 0.0.40
codegen_flags: <defaults>
</compile_context>

<pallas_src>
import functools

import numpy as np
import jax
import jax.numpy as jnp
from jax import lax
from jax.experimental import pallas as pl
from jax.experimental.pallas import tpu as pltpu


# Static maxima for the compile-once fast path (bucketed small: realistic SORT
# pedestrian counts are ~8 trackers x ~16 detections).
MAX_TRACKERS = 32    # sublane axis, multiple of 8
MAX_DETS = 128       # lane axis, multiple of 128 -> unmasked lane-dense stores

_VMEM_LIMIT_BYTES = 32 * 1024 * 1024   # portable: <= physical on v5e/v6e/v7x


def _iou_kernel(nm_ref, b1_ref, b2_ref, iou_ref, cmax_ref):
    # nm_ref  : (2,) int32 SMEM scalar-prefetch: [n_real_trackers, m_real_dets]
    # b1_ref  : (n_pad, 4)  tracker boxes, fully VMEM-resident across the grid
    # b2_ref  : (4, tm)     detection boxes, coordinate-major (lanes = detections)
    # iou_ref : (n_pad, tm) IoU tile (tm % 128 == 0 -> lane-dense stores)
    # cmax_ref: (1, tm)     per-detection max IoU over trackers
    n = nm_ref[0]
    m = nm_ref[1]
    j = pl.program_id(0)
    nt, tm = iou_ref.shape

    x1a = b1_ref[:, 0:1]
    y1a = b1_ref[:, 1:2]
    x2a = b1_ref[:, 2:3]
    y2a = b1_ref[:, 3:4]

    x1b = b2_ref[0:1, :]
    y1b = b2_ref[1:2, :]
    x2b = b2_ref[2:3, :]
    y2b = b2_ref[3:4, :]

    # broadcast (n_pad,1) vs (1,tm) -> (n_pad,tm), all VPU work
    iw = jnp.maximum(jnp.minimum(x2a, x2b) - jnp.maximum(x1a, x1b) + 1.0, 0.0)
    ih = jnp.maximum(jnp.minimum(y2a, y2b) - jnp.maximum(y1a, y1b) + 1.0, 0.0)
    inter = iw * ih

    area1 = (x2a - x1a + 1.0) * (y2a - y1a + 1.0)   # (n_pad, 1)
    area2 = (x2b - x1b + 1.0) * (y2b - y1b + 1.0)   # (1, tm)
    union = area1 + area2 - inter                   # >= 1 for zero-padded boxes

    # EUP vrcp seed (otherwise-idle slot) + Newton-Raphson refinement on the
    # VPU.  One step is typically enough for 1e-5; a second costs two more
    # VPU ops on a handful of vregs and guarantees it.
    r = pl.reciprocal(union, approx=True)
    r = r * (2.0 - union * r)
    r = r * (2.0 - union * r)

    # Mask the padded region to exactly 0 so padded rows/cols never produce
    # spurious matches downstream and the column-max is correct.
    row = lax.broadcasted_iota(jnp.int32, (nt, tm), 0)
    col = lax.broadcasted_iota(jnp.int32, (nt, tm), 1) + j * tm
    valid = (row < n) & (col < m)
    iou = jnp.where(valid, inter * r, 0.0)

    iou_ref[...] = iou
    cmax_ref[...] = jnp.max(iou, axis=0, keepdims=True)


def _iou_pallas(nm, b1, b2t, *, tm):
    """pallas_call on already-padded inputs.

    nm  : (2,)  int32 [n_real, m_real]  (scalar-prefetched to SMEM)
    b1  : (n_pad, 4)  float32
    b2t : (4, m_pad)  float32, m_pad % tm == 0, tm % 128 == 0
    returns (iou (n_pad, m_pad), col_max (1, m_pad)); padded region is 0.
    """
    n_pad = b1.shape[0]
    m_pad = b2t.shape[1]
    grid_m = m_pad // tm
    return pl.pallas_call(
        _iou_kernel,
        out_shape=(
            jax.ShapeDtypeStruct((n_pad, m_pad), jnp.float32),
            jax.ShapeDtypeStruct((1, m_pad), jnp.float32),
        ),
        grid_spec=pltpu.PrefetchScalarGridSpec(
            num_scalar_prefetch=1,
            grid=(grid_m,),                                      # 1 step for SORT sizes
            in_specs=[
                pl.BlockSpec((n_pad, 4), lambda j, nm: (0, 0)),  # trackers: resident
                pl.BlockSpec((4, tm), lambda j, nm: (0, j)),     # detections: lane tiles
            ],
            out_specs=[
                pl.BlockSpec((n_pad, tm), lambda j, nm: (0, j)),
                pl.BlockSpec((1, tm), lambda j, nm: (0, j)),
            ],
        ),
        compiler_params=pltpu.CompilerParams(
            # grid is (1,) on the fast path: nothing to shard across TCs, so
            # don't pretend.  Real dual-TC use would come from a batch axis.
            dimension_semantics=("arbitrary",),
            vmem_limit_bytes=_VMEM_LIMIT_BYTES,
        ),
    )(nm, b1, b2t)


def _round_up(x, k):
    return -(-max(x, 1) // k) * k


# -----------------------------------------------------------------------------
# Compile-once fast path: fixed-shape inputs, scalar n/m, one dispatch/frame.
# -----------------------------------------------------------------------------
def pad_boxes_fixed(boxes1, boxes2):
    """Host-side (numpy) padding to the static maxima: zero device dispatches."""
    n = int(boxes1.shape[0])
    m = int(boxes2.shape[0])
    assert n <= MAX_TRACKERS and m <= MAX_DETS
    b1 = np.zeros((MAX_TRACKERS, 4), np.float32)
    b1[:n] = np.asarray(boxes1, np.float32)
    b2 = np.zeros((MAX_DETS, 4), np.float32)
    b2[:m] = np.asarray(boxes2, np.float32)
    return b1, b2, n, m


@jax.jit
def pairwise_iou_fixed(b1_fixed, b2_fixed, n, m):
    """Compile-once fast path (one compilation for the whole tracking run).

    b1_fixed: (MAX_TRACKERS, 4) f32, rows >= n ignored (masked in-kernel)
    b2_fixed: (MAX_DETS, 4)     f32, rows >= m ignored
    n, m    : scalar counts (traced -> no recompiles as they vary per frame)

    Returns (iou, col_max):
      iou     : (MAX_TRACKERS, MAX_DETS) with the padded region exactly 0
      col_max : (MAX_DETS,) max IoU per detection over trackers (padded cols 0),
                usable directly for the `max(iou[:, i]) < IOU_MIN` gate.
    """
    nm = jnp.stack([jnp.asarray(n, jnp.int32), jnp.asarray(m, jnp.int32)])
    b1 = b1_fixed.astype(jnp.float32)
    b2t = b2_fixed.astype(jnp.float32).T           # fused inside this jit
    iou, cmax = _iou_pallas(nm, b1, b2t, tm=MAX_DETS)
    return iou, cmax[0]


# -----------------------------------------------------------------------------
# Convenience path: arbitrary (N, M); pad + transpose + kernel + slice fused
# into a single jitted dispatch (retraces per distinct (N, M) shape).
# -----------------------------------------------------------------------------
@jax.jit
def _pairwise_iou_traced(boxes1, boxes2):
    n = boxes1.shape[0]
    m = boxes2.shape[0]
    n_pad = _round_up(n, 8)
    m_pad = _round_up(m, 128)
    tm = min(m_pad, 2048)                # big lane-dense tiles, few grid steps
    m_pad = _round_up(m_pad, tm)         # only changes anything when m_pad > 2048

    b1 = jnp.zeros((n_pad, 4), jnp.float32).at[:n, :].set(boxes1.astype(jnp.float32))
    b2t = jnp.zeros((4, m_pad), jnp.float32).at[:, :m].set(boxes2.astype(jnp.float32).T)
    nm = jnp.array([n, m], jnp.int32)

    iou, cmax = _iou_pallas(nm, b1, b2t, tm=tm)
    return iou[:n, :m], cmax[0, :m]


def pairwise_iou(boxes1, boxes2):
    """compute_iou(boxes1, boxes2): (N,4),(M,4) -> (N,M) IoU matrix."""
    iou, _ = _pairwise_iou_traced(boxes1, boxes2)
    return iou


# -----------------------------------------------------------------------------
# Pure-JAX reference and synthetic inputs
# -----------------------------------------------------------------------------
def compute_iou_ref(boxes1, boxes2):
    """Pure-JAX reference mirroring the PyTorch compute_iou exactly."""
    b1 = boxes1[:, None, :]
    b2 = boxes2[None, :, :]
    inter_x1 = jnp.maximum(b1[..., 0], b2[..., 0])
    inter_y1 = jnp.maximum(b1[..., 1], b2[..., 1])
    inter_x2 = jnp.minimum(b1[..., 2], b2[..., 2])
    inter_y2 = jnp.minimum(b1[..., 3], b2[..., 3])
    inter = jnp.clip(inter_x2 - inter_x1 + 1, 0) * jnp.clip(inter_y2 - inter_y1 + 1, 0)
    area1 = (b1[..., 2] - b1[..., 0] + 1) * (b1[..., 3] - b1[..., 1] + 1)
    area2 = (b2[..., 2] - b2[..., 0] + 1) * (b2[..., 3] - b2[..., 1] + 1)
    return inter / (area1 + area2 - inter)


def _make_boxes(key, n, max_xy=256.0):
    """Deterministic synthetic xyxy boxes (stand-in for detector output)."""
    k1, k2 = jax.random.split(key)
    xy1 = jax.random.uniform(k1, (n, 2), minval=0.0, maxval=max_xy * 0.5)
    wh = jax.random.uniform(k2, (n, 2), minval=8.0, maxval=max_xy * 0.4)
    return jnp.concatenate([xy1, xy1 + wh], axis=-1).astype(jnp.float32)


if __name__ == "__main__":
    key = jax.random.PRNGKey(0)
    k_img, k_trk, k_det, k_trk2, k_det2 = jax.random.split(key, 5)

    # The nn.Module forward takes an image batch; the detector is not
    # translated, so the kernel consumes post-detection boxes.
    # TODO(synk): fasterrcnn_resnet50_fpn detector is not translatable to a Pallas kernel.
    x_image = jax.random.normal(k_img, (1, 3, 64, 64), jnp.float32)  # NCHW, unused
    del x_image

    # --- SORT-realistic sizes ------------------------------------------------
    tracker_boxes = _make_boxes(k_trk, 8)    # tracker2box(self.trackers) -> (N, 4)
    det_boxes = _make_boxes(k_det, 16)       # self.detect(x)             -> (M, 4)
    iou_ref = compute_iou_ref(tracker_boxes, det_boxes)

    # Convenience path (single fused dispatch).
    iou = jax.block_until_ready(pairwise_iou(tracker_boxes, det_boxes))
    assert iou.shape == (8, 16)
    assert jnp.allclose(iou, iou_ref, atol=1e-5, rtol=1e-5), "IoU mismatch vs reference"

    # Compile-once fixed path: host padding + one device dispatch per frame.
    b1f, b2f, n, m = pad_boxes_fixed(tracker_boxes, det_boxes)
    iou_fixed, col_max = pairwise_iou_fixed(b1f, b2f, n, m)
    iou_fixed = jax.block_until_ready(iou_fixed)
    assert iou_fixed.shape == (MAX_TRACKERS, MAX_DETS)
    assert jnp.allclose(iou_fixed[:n, :m], iou_ref, atol=1e-5, rtol=1e-5)
    assert jnp.all(iou_fixed[n:, :] == 0.0) and jnp.all(iou_fixed[:, m:] == 0.0), \
        "padded region not zero-masked"
    assert jnp.allclose(col_max[:m], iou_ref.max(axis=0), atol=1e-5, rtol=1e-5)
    assert jnp.all(col_max[m:] == 0.0)

    # A second frame with different counts reuses the same compiled kernel.
    b1f2, b2f2, n2, m2 = pad_boxes_fixed(_make_boxes(k_trk2, 5), _make_boxes(k_det2, 11))
    iou_fixed2, _ = pairwise_iou_fixed(b1f2, b2f2, n2, m2)
    jax.block_until_ready(iou_fixed2)
    assert iou_fixed2.shape == (MAX_TRACKERS, MAX_DETS)

    # --- Oversized fallback path (beyond the static maxima) ------------------
    big_trk = _make_boxes(k_trk2, 40)
    big_det = _make_boxes(k_det2, 300)
    iou_big = jax.block_until_ready(pairwise_iou(big_trk, big_det))
    iou_big_ref = compute_iou_ref(big_trk, big_det)
    assert iou_big.shape == (40, 300)
    assert jnp.allclose(iou_big, iou_big_ref, atol=1e-5, rtol=1e-5), "IoU mismatch (big)"

    # TODO(synk): Hungarian assignment (scipy linear_assignment), Kalman-filter
    # predict/update, and dynamic tracker-ID dict management remain host-side.

    print("KERNEL_OK")
</pallas_src>

<mosaic_0001>
module attributes {stable_mosaic.version = 11 : i64} {
  func.func @_iou_kernel(%arg0: i32, %arg1: memref<2xi32, #tpu.memory_space<smem>>, %arg2: memref<8x4xf32, #tpu.memory_space<vmem>>, %arg3: memref<4x128xf32, #tpu.memory_space<vmem>>, %arg4: memref<8x128xf32, #tpu.memory_space<vmem>>, %arg5: memref<1x128xf32, #tpu.memory_space<vmem>>) attributes {dimension_semantics = [#tpu.dimension_semantics<arbitrary>], iteration_bounds = array<i64: 1>, scalar_prefetch = 1 : i64, scratch_operands = 0 : i64, tpu.core_type = #tpu.core_type<tc>, window_params = [{pipeline_mode = #tpu.pipeline_mode<synchronous>, transform_indices = @transform_0, window_bounds = array<i64: 8, 4>}, {transform_indices = @transform_1, window_bounds = array<i64: 4, 128>}, {transform_indices = @transform_2, window_bounds = array<i64: 8, 128>}, {transform_indices = @transform_3, window_bounds = array<i64: 1, 128>}]} {
    %c0 = arith.constant 0 : index
    %0 = memref.load %arg1[%c0] : memref<2xi32, #tpu.memory_space<smem>>
    %c1 = arith.constant 1 : index
    %1 = memref.load %arg1[%c1] : memref<2xi32, #tpu.memory_space<smem>>
    %c0_0 = arith.constant 0 : index
    %c0_1 = arith.constant 0 : index
    %2 = vector.load %arg2[%c0_0, %c0_1] : memref<8x4xf32, #tpu.memory_space<vmem>>, vector<8x1xf32>
    %c0_2 = arith.constant 0 : index
    %c1_3 = arith.constant 1 : index
    %3 = vector.load %arg2[%c0_2, %c1_3] : memref<8x4xf32, #tpu.memory_space<vmem>>, vector<8x1xf32>
    %c0_4 = arith.constant 0 : index
    %c2 = arith.constant 2 : index
    %4 = vector.load %arg2[%c0_4, %c2] : memref<8x4xf32, #tpu.memory_space<vmem>>, vector<8x1xf32>
    %c0_5 = arith.constant 0 : index
    %c3 = arith.constant 3 : index
    %5 = vector.load %arg2[%c0_5, %c3] : memref<8x4xf32, #tpu.memory_space<vmem>>, vector<8x1xf32>
    %c0_6 = arith.constant 0 : index
    %c0_7 = arith.constant 0 : index
    %6 = vector.load %arg3[%c0_6, %c0_7] : memref<4x128xf32, #tpu.memory_space<vmem>>, vector<1x128xf32>
    %c1_8 = arith.constant 1 : index
    %c0_9 = arith.constant 0 : index
    %7 = vector.load %arg3[%c1_8, %c0_9] : memref<4x128xf32, #tpu.memory_space<vmem>>, vector<1x128xf32>
    %c2_10 = arith.constant 2 : index
    %c0_11 = arith.constant 0 : index
    %8 = vector.load %arg3[%c2_10, %c0_11] : memref<4x128xf32, #tpu.memory_space<vmem>>, vector<1x128xf32>
    %c3_12 = arith.constant 3 : index
    %c0_13 = arith.constant 0 : index
    %9 = vector.load %arg3[%c3_12, %c0_13] : memref<4x128xf32, #tpu.memory_space<vmem>>, vector<1x128xf32>
    %10 = vector.broadcast %4 : vector<8x1xf32> to vector<8x128xf32>
    %11 = vector.broadcast %8 : vector<1x128xf32> to vector<8x128xf32>
    %12 = arith.minimumf %10, %11 : vector<8x128xf32>
    %13 = vector.broadcast %2 : vector<8x1xf32> to vector<8x128xf32>
    %14 = vector.broadcast %6 : vector<1x128xf32> to vector<8x128xf32>
    %15 = arith.maximumf %13, %14 : vector<8x128xf32>
    %16 = arith.subf %12, %15 : vector<8x128xf32>
    %cst = arith.constant 1.000000e+00 : f32
    %17 = vector.broadcast %cst : f32 to vector<8x128xf32>
    %18 = arith.addf %16, %17 : vector<8x128xf32>
    %cst_14 = arith.constant 0.000000e+00 : f32
    %19 = vector.broadcast %cst_14 : f32 to vector<8x128xf32>
    %20 = arith.maximumf %18, %19 : vector<8x128xf32>
    %21 = vector.broadcast %5 : vector<8x1xf32> to vector<8x128xf32>
    %22 = vector.broadcast %9 : vector<1x128xf32> to vector<8x128xf32>
    %23 = arith.minimumf %21, %22 : vector<8x128xf32>
    %24 = vector.broadcast %3 : vector<8x1xf32> to vector<8x128xf32>
    %25 = vector.broadcast %7 : vector<1x128xf32> to vector<8x128xf32>
    %26 = arith.maximumf %24, %25 : vector<8x128xf32>
    %27 = arith.subf %23, %26 : vector<8x128xf32>
    %cst_15 = arith.constant 1.000000e+00 : f32
    %28 = vector.broadcast %cst_15 : f32 to vector<8x128xf32>
    %29 = arith.addf %27, %28 : vector<8x128xf32>
    %cst_16 = arith.constant 0.000000e+00 : f32
    %30 = vector.broadcast %cst_16 : f32 to vector<8x128xf32>
    %31 = arith.maximumf %29, %30 : vector<8x128xf32>
    %32 = arith.mulf %20, %31 : vector<8x128xf32>
    %33 = arith.subf %4, %2 : vector<8x1xf32>
    %cst_17 = arith.constant 1.000000e+00 : f32
    %34 = vector.broadcast %cst_17 : f32 to vector<8x1xf32>
    %35 = arith.addf %33, %34 : vector<8x1xf32>
    %36 = arith.subf %5, %3 : vector<8x1xf32>
    %cst_18 = arith.constant 1.000000e+00 : f32
    %37 = vector.broadcast %cst_18 : f32 to vector<8x1xf32>
    %38 = arith.addf %36, %37 : vector<8x1xf32>
    %39 = arith.mulf %35, %38 : vector<8x1xf32>
    %40 = arith.subf %8, %6 : vector<1x128xf32>
    %cst_19 = arith.constant 1.000000e+00 : f32
    %41 = vector.broadcast %cst_19 : f32 to vector<1x128xf32>
    %42 = arith.addf %40, %41 : vector<1x128xf32>
    %43 = arith.subf %9, %7 : vector<1x128xf32>
    %cst_20 = arith.constant 1.000000e+00 : f32
    %44 = vector.broadcast %cst_20 : f32 to vector<1x128xf32>
    %45 = arith.addf %43, %44 : vector<1x128xf32>
    %46 = arith.mulf %42, %45 : vector<1x128xf32>
    %47 = vector.broadcast %39 : vector<8x1xf32> to vector<8x128xf32>
    %48 = vector.broadcast %46 : vector<1x128xf32> to vector<8x128xf32>
    %49 = arith.addf %47, %48 : vector<8x128xf32>
    %50 = arith.subf %49, %32 : vector<8x128xf32>
    %51 = tpu.reciprocal %50 {approx = true} : vector<8x128xf32> -> vector<8x128xf32>
    %52 = arith.mulf %50, %51 : vector<8x128xf32>
    %cst_21 = arith.constant 2.000000e+00 : f32
    %53 = vector.broadcast %cst_21 : f32 to vector<8x128xf32>
    %54 = arith.subf %53, %52 : vector<8x128xf32>
    %55 = arith.mulf %51, %54 : vector<8x128xf32>
    %56 = arith.mulf %50, %55 : vector<8x128xf32>
    %cst_22 = arith.constant 2.000000e+00 : f32
    %57 = vector.broadcast %cst_22 : f32 to vector<8x128xf32>
    %58 = arith.subf %57, %56 : vector<8x128xf32>
    %59 = arith.mulf %55, %58 : vector<8x128xf32>
    %60 = tpu.iota {dimensions = array<i32: 0>} : vector<8x128xi32>
    %61 = tpu.iota {dimensions = array<i32: 1>} : vector<8x128xi32>
    %c128_i32 = arith.constant 128 : i32
    %62 = arith.muli %arg0, %c128_i32 : i32
    %63 = vector.broadcast %62 : i32 to vector<8x128xi32>
    %64 = arith.addi %61, %63 : vector<8x128xi32>
    %65 = vector.broadcast %0 : i32 to vector<8x128xi32>
    %66 = arith.cmpi slt, %60, %65 : vector<8x128xi32>
    %67 = vector.broadcast %1 : i32 to vector<8x128xi32>
    %68 = arith.cmpi slt, %64, %67 : vector<8x128xi32>
    %69 = arith.andi %66, %68 : vector<8x128xi1>
    %70 = arith.mulf %32, %59 : vector<8x128xf32>
    %cst_23 = arith.constant 0.000000e+00 : f32
    %71 = vector.broadcast %cst_23 : f32 to vector<8x128xf32>
    %72 = arith.select %69, %70, %71 : vector<8x128xi1>, vector<8x128xf32>
    %c0_24 = arith.constant 0 : index
    %c0_25 = arith.constant 0 : index
    %73 = vector.load %arg4[%c0_24, %c0_25] : memref<8x128xf32, #tpu.memory_space<vmem>>, vector<8x128xf32>
    tpu.vector_store %arg4[%c0_24, %c0_25], %72 {strides = array<i32>} : memref<8x128xf32, #tpu.memory_space<vmem>>, vector<8x128xf32>,
    %cst_26 = arith.constant dense<0xFF800000> : vector<128xf32>
    %74 = vector.multi_reduction <maximumf>, %72, %cst_26 [0] : vector<8x128xf32> to vector<128xf32>
    %75 = vector.shape_cast %74 : vector<128xf32> to vector<1x128xf32>
    %c0_27 = arith.constant 0 : index
    %c0_28 = arith.constant 0 : index
    %76 = vector.load %arg5[%c0_27, %c0_28] : memref<1x128xf32, #tpu.memory_space<vmem>>, vector<1x128xf32>
    tpu.vector_store %arg5[%c0_27, %c0_28], %75 {strides = array<i32>} : memref<1x128xf32, #tpu.memory_space<vmem>>, vector<1x128xf32>,
    return
  }
  func.func @transform_0(%arg0: i32, %arg1: memref<2xi32, #tpu.memory_space<smem>>) -> (i32, i32) {
    %c0_i32 = arith.constant 0 : i32
    %c0_i32_0 = arith.constant 0 : i32
    %c0_i32_1 = arith.constant 0 : i32
    return %c0_i32, %c0_i32_0 : i32, i32
  }
  func.func @transform_1(%arg0: i32, %arg1: memref<2xi32, #tpu.memory_space<smem>>) -> (i32, i32) {
    %c0_i32 = arith.constant 0 : i32
    %c0_i32_0 = arith.constant 0 : i32
    return %c0_i32, %arg0 : i32, i32
  }
  func.func @transform_2(%arg0: i32, %arg1: memref<2xi32, #tpu.memory_space<smem>>) -> (i32, i32) {
    %c0_i32 = arith.constant 0 : i32
    %c0_i32_0 = arith.constant 0 : i32
    return %c0_i32, %arg0 : i32, i32
  }
  func.func @transform_3(%arg0: i32, %arg1: memref<2xi32, #tpu.memory_space<smem>>) -> (i32, i32) {
    %c0_i32 = arith.constant 0 : i32
    %c0_i32_0 = arith.constant 0 : i32
    return %c0_i32, %arg0 : i32, i32
  }
}

</mosaic_0001>

<bundles_post_ra>
// kernel: _pairwise_iou_traced.1
= control target key start
LH: loop header
LB: loop body
LE: loop exit
PB: predicated region body
PF: predicated region fallthrough
CT: control target
= control target key end

     0   :  { %s266_s0 = inlined_call_operand.vmem [shape: s32[2], index: 0, kind: input, shape index: {}]   ;;  %s267_s1 = inlined_call_operand.vmem [shape: f32[8,4], index: 1, kind: input, shape index: {}]   ;;  %s268_s2 = inlined_call_operand.vmem [shape: f32[4,128], index: 2, kind: input, shape index: {}]   ;;  %s269_s3 = inlined_call_operand.hbm [shape: f32[8,128], index: 3, kind: output, shape index: {0}]   ;;  %s270_s4 = inlined_call_operand.vmem [shape: f32[1,128], index: 4, kind: output, shape index: {1}]  }
   0x1   :  { %s10_s17 = sshll.u32 %s266_s0, 4  ;;  %s11_s17 = int_to_ptr.vmem [resolvable:$true] %s10_s17 }
   0x2   :  { %s162_s18 = scalar_lea.vmem %s11_s17, 16  ;;  %p167_p1 = scmp.lt.s32.totalorder %s11_s17, %s11_s17 }
   0x3   :  { %p163_p0 = scmp.ne.s32.totalorder %s11_s17, %s162_s18  ;;  %p168_p2 = scmp.lt.s32.totalorder %s162_s18, %s162_s18 }
   0x5   :  { %p169_p3 = por %p168_p2, %p167_p1 }
   0x7   :  { %p170_p4 = pnand %p169_p3, %p163_p0 }
   0x9   :  { %173 = shalt.err (!%p170_p4)  }
   0xa   :  { %s200_s19 = smov [#allocation3]  }
   0xb   :  { %13 = dma.vmem_to_smem %s11_s17, 16, %s200_s19, [#allocation2] }
   0xc   :  { %196 = dma.done.wait [#allocation2], 16 }
   0xd   :  { %197 = vsyncadd [#allocation2], 4294967280 }
   0xe   :  { %15 = sfence }
   0xf   :  { %v23_v0 = vld [vmem:[%s267_s1] sm:$0xff]  ;;  %s201_s22 = smov 2   ;;  %v202_v1 = vmov 2  }
  0x10   :  { %72 = vrot.lane.b32.xlu0 %v23_v0, %s201_s22  ;;  %154 = vset.pattern.permute.xlu1 %v202_v1 }
  0x11   :  { %16 = vsyncpa [#allocation5], 0  ;;  %30 = vperm.xlu1 %154, %v23_v0   ;;  %v203_v2 = vmov 3   ;;  %v204_v3 = vmov 0   ;;  %v205_v4 = vmov 1   ;;  %s206_s0 = smov 127   ;;  %v33_v10 = vlaneseq }
  0x12   :  { %156 = vset.pattern.permute.xlu0 %v203_v2  ;;  %v26_v14 = vld [vmem:[%s268_s2 + $0x2] sm:$0x1]  ;;  %v24_v16 = vld [vmem:[%s268_s2] sm:$0x1]  ;;  %v25_v17 = vld [vmem:[%s268_s2 + $0x1] sm:$0x1] }
  0x13   :  { %v34_v12 = vshrl.u32 %v33_v10, 7  ;;  %v27_v18 = vld [vmem:[%s268_s2 + $0x3] sm:$0x1]  ;;  %v82_v25 = vsub.f32 %v26_v14, %v24_v16  ;;  %s21_s2 = sld [smem:[#allocation3]]  ;;  %s145_s30 = sld [smem:[#allocation3 + $0x1]]  ;;  %v108_v49 = vand.u32 127, %v33_v10 }
  0x14   :  { %v84_v26 = vsub.f32 %v27_v18, %v25_v17  ;;  %s207_s5 = smov [#allocation4]  }
  0x15   :  { %155 = vset.pattern.permute.xlu1 %v204_v3  ;;  %v35_v15 = vsub.s32 0, %v34_v12  ;;  %v83_v31 = vadd.f32 1.0, %v82_v25  ;;  %s133_s6 = sshll.u32 %s207_s5, 4  ;;  %s134_s6 = int_to_ptr.vmem [resolvable:$true] %s133_s6 }
  0x16   :  { %39 = vperm.xlu1 %155, %v23_v0   ;;  %v85_v33 = vadd.f32 1.0, %v84_v26  ;;  %s174_s7 = scalar_lea.vmem %s134_s6, 128  ;;  %p179_p6 = scmp.lt.s32.totalorder %s134_s6, %s134_s6 }
  0x17   :  { %v36_v19 = vrot.slane %v26_v14, %v35_v15  ;;  %v45_v20 = vrot.slane %v24_v16, %v35_v15  ;;  %v66_v21 = vrot.slane %v25_v17, %v35_v15  ;;  %v57_v22 = vrot.slane %v27_v18, %v35_v15  ;;  %p175_p5 = scmp.ne.s32.totalorder %s134_s6, %s174_s7  ;;  %p180_p7 = scmp.lt.s32.totalorder %s174_s7, %s174_s7 }
  0x18   :  { %v86_v37 = vmul.f32 %v85_v33, %v83_v31 }
  0x19   :  { %v112_v50 = vstv %s21_s2  ;;  %v114_v51 = vstv %s145_s30  ;;  %p181_p8 = por %p180_p7, %p179_p6 }
  0x1a   :  { %157 = vset.pattern.permute.xlu1 %v205_v4  ;;  %v95_v40 = vrot.slane %v86_v37, %v35_v15  ;;  %vm113_vm0 = vcmp.lt.s32.totalorder %v34_v12, %v112_v50  ;;  %vm115_vm1 = vcmp.lt.s32.totalorder %v108_v49, %v114_v51 }
  0x1b   :  { %60 = vperm.xlu1 %157, %v23_v0   ;;  %vm116_vm2 = vmand %vm113_vm0, %vm115_vm1  ;;  %p182_p9 = pnand %p181_p8, %p175_p5 }
  0x1f   :  { %158 = vset.pattern.permute.xlu1 %v202_v1 }
  0x82   :  { %v73_v5 = vpop.permute.xlu0 %72 }
  0x83   :  { %v75_v6 = vsub.f32 %v23_v0, %v73_v5 }
  0x85   :  { %v76_v7 = vadd.f32 1.0, %v75_v6 }
  0x87   :  { %78 = vrot.lane.b32.xlu0 %v76_v7, %s206_s0 }
  0x8b   :  { %51 = vperm.xlu0 %156, %v23_v0  }
  0x8f   :  { %159 = vset.pattern.permute.xlu0 %v202_v1 }
  0x90   :  { %v31_v11 = vpop.permute.xlu1 %30 }
  0x91   :  { %v37_v27 = vmin.f32 %v31_v11, %v36_v19 }
  0x95   :  { %v40_v13 = vpop.permute.xlu1 %39 }
  0x96   :  { %v46_v28 = vmax.f32 %v40_v13, %v45_v20 }
  0x98   :  { %v47_v32 = vsub.f32 %v37_v27, %v46_v28 }
  0x9a   :  { %v61_v23 = vpop.permute.xlu1 %60  ;;  %v48_v35 = vadd.f32 1.0, %v47_v32 }
  0x9b   :  { %v67_v29 = vmax.f32 %v61_v23, %v66_v21 }
  0x9c   :  { %v49_v38 = vmax.f32 %v48_v35, 0.0 }
  0xf9   :  { %v79_v8 = vpop.permute.xlu0 %78 }
  0xfa   :  { %v81_v9 = vmul.f32 %v79_v8, %v76_v7 }
  0xfc   :  { %89 = vperm.xlu1 %158, %v81_v9  }
 0x10a   :  { %v52_v24 = vpop.permute.xlu0 %51 }
 0x10b   :  { %v58_v30 = vmin.f32 %v52_v24, %v57_v22 }
 0x10d   :  { %v68_v34 = vsub.f32 %v58_v30, %v67_v29 }
 0x10f   :  { %v69_v36 = vadd.f32 1.0, %v68_v34 }
 0x111   :  { %v70_v39 = vmax.f32 %v69_v36, 0.0 }
 0x113   :  { %v71_v42 = vmul.f32 %v70_v39, %v49_v38 }
 0x17b   :  { %v90_v41 = vpop.permute.xlu1 %89 }
 0x17c   :  { %v96_v43 = vadd.f32 %v95_v40, %v90_v41 }
 0x17e   :  { %v97_v44 = vsub.f32 %v96_v43, %v71_v42 }
 0x180   :  { %160 = vrcp.f32 %v97_v44 }
 0x18a   :  { %v161_v45 = vpop.eup %160 }
 0x18b   :  { %v99_v46 = vmul.f32 %v161_v45, %v97_v44 }
 0x18d   :  { %v100_v47 = vsub.f32 2.0, %v99_v46 }
 0x18f   :  { %v101_v48 = vmul.f32 %v161_v45, %v100_v47 }
 0x191   :  { %v102_v52 = vmul.f32 %v101_v48, %v97_v44 }
 0x193   :  { %v103_v53 = vsub.f32 2.0, %v102_v52 }
 0x195   :  { %v104_v54 = vmul.f32 %v103_v53, %v101_v48 }
 0x197   :  { %v117_v55 = vmul.f32 %v104_v54, %v71_v42 }
 0x199   :  { %v118_v56 = vsel %vm116_vm2, %v117_v55, 0.0 }
 0x19a   :  { %119 = vst [vmem:[#allocation4] sm:$0xff] %v118_v56  ;;  %v120_v57 = vrot.slane %v118_v56, 4 }
 0x19b   :  { %185 = shalt.err (!%p182_p9)
}
 0x19c   :  { %s186_s10 = scalar_lea.hbm %s269_s3, 128 }
 0x19d   :  { %p187_p10 = scmp.ne.s32.totalorder %s269_s3, %s186_s10  ;;  %p190_p11 = scmp.lt.u32.totalorder %s186_s10, %s269_s3 }
 0x19f   :  { %p192_p12 = pnand %p190_p11, %p187_p10 }
 0x1a1   :  { %195 = shalt.err (!%p192_p12)
}
 0x1a2   :  { %136 = dma.vmem_to_hbm [thread:$0]  %s134_s6, 128, %s269_s3, [#allocation5]   ;;  %v121_v58 = vmax.f32 %v118_v56, %v120_v57 }
 0x1a4   :  { %v122_v59 = vrot.slane %v121_v58, 2 }
 0x1a6   :  { %v123_v60 = vmax.f32 %v121_v58, %v122_v59 }
 0x1a8   :  { %v124_v61 = vrot.slane %v123_v60, 1 }
 0x1aa   :  { %v125_v62 = vmax.f32 %v123_v60, %v124_v61 }
 0x1ac   :  { %126 = vst [vmem:[%s270_s4] sm:$0x1] %v125_v62 }
 0x1ad   :  { %198 = dma.done.wait [#allocation5], 128  }
 0x1ae   :  { %199 = vsyncadd [#allocation5], 4294967168 }
 0x1af   :  { %144 = vsyncpa [#allocation5], 1 }

</bundles_post_ra>
